<compile_context>
chip_gen: v7x
topology: tpu7x:2x2x1
jax: 0.10.0
libtpu: 0.0.40
codegen_flags: <defaults>
</compile_context>

<pallas_src>
import functools

import jax
import jax.numpy as jnp
from jax import lax
from jax.experimental import pallas as pl
from jax.experimental.pallas import tpu as pltpu


def _round_up(n, m):
    return ((n + m - 1) // m) * m


def _causal_conv1d_kernel(x_halo_ref, x_ref, w_ref, b_ref, o_ref, win_ref, *,
                          kernel_size, dilation, pad_left, halo_up, tile_l):
    # x_halo_ref: (1, C_in, HALO_UP)       elements [t*TILE_L - HALO_UP, t*TILE_L) of x
    #                                      (garbage/duplicate for t == 0 -> zero-filled)
    # x_ref:      (1, C_in, TILE_L)        elements [t*TILE_L, (t+1)*TILE_L) of x
    # w_ref:      (K, C_out, C_in)
    # b_ref:      (C_out, 1)
    # o_ref:      (1, C_out, TILE_L)       lane-dense output tile (last one masked by Pallas)
    # win_ref:    (C_in, HALO_UP + TILE_L) VMEM scratch: assembled halo'd window
    t = pl.program_id(0)
    c_in = win_ref.shape[0]
    c_out = o_ref.shape[1]

    # Assemble [left context | current tile] in VMEM (both stores lane-aligned).
    @pl.when(t == 0)
    def _():
        # First time tile: the causal left pad is all zeros.
        win_ref[:, :halo_up] = jnp.zeros((c_in, halo_up), dtype=win_ref.dtype)

    @pl.when(t > 0)
    def _():
        win_ref[:, :halo_up] = x_halo_ref[0]

    win_ref[:, halo_up:] = x_ref[0]

    # Accumulator starts at the bias (saves a zeros init + a full-tile add).
    acc = jnp.broadcast_to(b_ref[...], (c_out, tile_l)).astype(jnp.float32)
    for k in range(kernel_size):                       # K is small: static unroll
        off = halo_up - pad_left + k * dilation        # static, 0 <= off <= halo_up
        xk = win_ref[:, off:off + tile_l]              # (C_in, TILE_L)
        acc = acc + jnp.dot(w_ref[k], xk, preferred_element_type=jnp.float32)
    o_ref[0] = acc.astype(o_ref.dtype)


def causal_conv1d(x, weight, bias, *, kernel_size, dilation=1, a=False, tile_l=1024):
    """x: (B, C_in, L), weight: (C_out, C_in, K), bias: (C_out,) -> (B, C_out, L)."""
    B, C_in, L = x.shape
    C_out = weight.shape[0]
    K = kernel_size
    pad_left = (K - 1) * dilation + (1 if a else 0)    # PyTorch causal left pad

    # Halo slab: lane-aligned, covers the whole left context each tile needs.
    HALO_UP = max(128, _round_up(pad_left, 128))

    # Lane-aligned time tile; must be a multiple of HALO_UP so the halo block
    # index lines up exactly with "the HALO_UP elements before this tile".
    TILE_L = _round_up(min(max(tile_l, 128), _round_up(L, 128)), 128)
    TILE_L = _round_up(max(TILE_L, HALO_UP), HALO_UP)

    # VMEM budget clamp: stay well under the default scoped VMEM on every
    # generation (16 MiB v5e, 32 MiB v6e/v7x) even for large channel counts.
    isz = jnp.dtype(x.dtype).itemsize

    def _vmem_bytes(tile):
        return (2 * C_in * tile * isz                  # double-buffered current tile
                + 2 * C_in * HALO_UP * isz             # double-buffered halo slab
                + 2 * C_out * tile * isz               # double-buffered output tile
                + C_in * (HALO_UP + tile) * isz        # assembled window scratch
                + C_out * tile * 4                     # f32 accumulator (may spill)
                + 2 * K * C_out * C_in * isz + 2 * C_out * isz)

    VMEM_BUDGET = 12 * 1024 * 1024
    while TILE_L > HALO_UP and _vmem_bytes(TILE_L) > VMEM_BUDGET:
        TILE_L = max(HALO_UP, _round_up(TILE_L // 2, HALO_UP))

    num_tiles = pl.cdiv(L, TILE_L)
    r = TILE_L // HALO_UP                              # halo blocks per time tile

    w = jnp.transpose(weight, (2, 0, 1))               # (K, C_out, C_in): tiny
    b = bias.reshape(C_out, 1)

    kernel = functools.partial(
        _causal_conv1d_kernel, kernel_size=K, dilation=dilation,
        pad_left=pad_left, halo_up=HALO_UP, tile_l=TILE_L)

    # Grid = (time tiles, batch): time-major so megacore (v7x) splits time tiles
    # even for B == 1.  Output length is the true L — Pallas masks the partial
    # last block, so no wrapper slice (and no wrapper pad) is needed.
    return pl.pallas_call(
        kernel,
        out_shape=jax.ShapeDtypeStruct((B, C_out, L), x.dtype),
        grid_spec=pltpu.PrefetchScalarGridSpec(
            num_scalar_prefetch=0,
            grid=(num_tiles, B),
            in_specs=[
                # Halo: the HALO_UP elements immediately preceding this tile
                # (block index clamped to 0 for the first tile; zero-filled in-kernel).
                pl.BlockSpec((1, C_in, HALO_UP),
                             lambda t, bi: (bi, 0, jnp.maximum(t * r - 1, 0))),
                # Current tile (fetched exactly once per element).
                pl.BlockSpec((1, C_in, TILE_L), lambda t, bi: (bi, 0, t)),
                pl.BlockSpec((K, C_out, C_in), lambda t, bi: (0, 0, 0)),
                pl.BlockSpec((C_out, 1), lambda t, bi: (0, 0)),
            ],
            out_specs=pl.BlockSpec((1, C_out, TILE_L), lambda t, bi: (bi, 0, t)),
            scratch_shapes=[pltpu.VMEM((C_in, HALO_UP + TILE_L), x.dtype)],
        ),
        compiler_params=pltpu.CompilerParams(
            dimension_semantics=("parallel", "parallel")),
    )(x, x, w, b)


def _reference(x, weight, bias, *, kernel_size, dilation, a):
    padding = (kernel_size - 1) * dilation + (1 if a else 0)
    x_pad = jnp.pad(x, ((0, 0), (0, 0), (padding, 0)))
    out = lax.conv_general_dilated(
        x_pad, weight,
        window_strides=(1,), padding="VALID",
        rhs_dilation=(dilation,),
        dimension_numbers=("NCH", "OIH", "NCH"),
    ) + bias[None, :, None]
    if a:
        out = out[:, :, :-1]
    return out


if __name__ == "__main__":
    key = jax.random.PRNGKey(0)
    kx, kw, kb, kx2, kw2, kb2 = jax.random.split(key, 6)

    # Case 1: small shapes consistent with the module's forward (single tile,
    # exercises the zero-filled halo and the masked partial output block).
    B, C_in, C_out, L = 2, 4, 8, 16
    kernel_size, dilation, a = 3, 2, True
    x = jax.random.normal(kx, (B, C_in, L), dtype=jnp.float32)
    weight = jax.random.normal(kw, (C_out, C_in, kernel_size), dtype=jnp.float32) * 0.1
    bias = jax.random.normal(kb, (C_out,), dtype=jnp.float32) * 0.1

    y = causal_conv1d(x, weight, bias,
                      kernel_size=kernel_size, dilation=dilation, a=a)
    y = jax.block_until_ready(y)
    y_ref = _reference(x, weight, bias,
                       kernel_size=kernel_size, dilation=dilation, a=a)
    assert y.shape == (B, C_out, L), y.shape
    assert jnp.allclose(y, y_ref, atol=1e-5, rtol=1e-5), "case 1 mismatch vs reference"

    # Case 2: longer sequence exercising the multi-tile / real-halo path.
    B2, C_in2, C_out2, L2 = 2, 4, 8, 300
    k2, d2, a2 = 5, 3, False
    x2 = jax.random.normal(kx2, (B2, C_in2, L2), dtype=jnp.float32)
    w2 = jax.random.normal(kw2, (C_out2, C_in2, k2), dtype=jnp.float32) * 0.1
    b2 = jax.random.normal(kb2, (C_out2,), dtype=jnp.float32) * 0.1
    y2 = causal_conv1d(x2, w2, b2, kernel_size=k2, dilation=d2, a=a2, tile_l=128)
    y2 = jax.block_until_ready(y2)
    y2_ref = _reference(x2, w2, b2, kernel_size=k2, dilation=d2, a=a2)
    assert y2.shape == (B2, C_out2, L2), y2.shape
    assert jnp.allclose(y2, y2_ref, atol=1e-5, rtol=1e-5), "case 2 mismatch vs reference"

    print("KERNEL_OK")
</pallas_src>

<mosaic_0001>
module attributes {stable_mosaic.version = 11 : i64} {
  func.func @_causal_conv1d_kernel(%arg0: i32, %arg1: i32, %arg2: memref<1x4x128xf32, #tpu.memory_space<vmem>>, %arg3: memref<1x4x128xf32, #tpu.memory_space<vmem>>, %arg4: memref<3x8x4xf32, #tpu.memory_space<vmem>>, %arg5: memref<8x1xf32, #tpu.memory_space<vmem>>, %arg6: memref<1x8x128xf32, #tpu.memory_space<vmem>>, %arg7: memref<4x256xf32, #tpu.memory_space<vmem>>) attributes {dimension_semantics = [#tpu.dimension_semantics<parallel>, #tpu.dimension_semantics<parallel>], iteration_bounds = array<i64: 1, 2>, scalar_prefetch = 0 : i64, scratch_operands = 1 : i64, tpu.core_type = #tpu.core_type<tc>, window_params = [{transform_indices = @transform_0, window_bounds = array<i64: 1, 4, 128>}, {transform_indices = @transform_1, window_bounds = array<i64: 1, 4, 128>}, {pipeline_mode = #tpu.pipeline_mode<synchronous>, transform_indices = @transform_2, window_bounds = array<i64: 3, 8, 4>}, {pipeline_mode = #tpu.pipeline_mode<synchronous>, transform_indices = @transform_3, window_bounds = array<i64: 8, 1>}, {transform_indices = @transform_4, window_bounds = array<i64: 1, 8, 128>}]} {
    %c0_i32 = arith.constant 0 : i32
    %0 = arith.cmpi eq, %arg0, %c0_i32 : i32
    %1 = arith.extui %0 : i1 to i32
    %c0_i32_0 = arith.constant 0 : i32
    %2 = arith.cmpi ne, %1, %c0_i32_0 : i32
    scf.if %2 {
      %cst_23 = arith.constant 0.000000e+00 : f32
      %30 = vector.broadcast %cst_23 : f32 to vector<4x128xf32>
      %c0_24 = arith.constant 0 : index
      %c0_25 = arith.constant 0 : index
      %31 = vector.load %arg7[%c0_24, %c0_25] : memref<4x256xf32, #tpu.memory_space<vmem>>, vector<4x128xf32>
      tpu.vector_store %arg7[%c0_24, %c0_25], %30 {strides = array<i32>} : memref<4x256xf32, #tpu.memory_space<vmem>>, vector<4x128xf32>,
    } else {
    }
    %c0_i32_1 = arith.constant 0 : i32
    %3 = arith.cmpi sgt, %arg0, %c0_i32_1 : i32
    %4 = arith.extui %3 : i1 to i32
    %c0_i32_2 = arith.constant 0 : i32
    %5 = arith.cmpi ne, %4, %c0_i32_2 : i32
    scf.if %5 {
      %c0_23 = arith.constant 0 : index
      %c0_24 = arith.constant 0 : index
      %c0_25 = arith.constant 0 : index
      %30 = vector.load %arg2[%c0_23, %c0_24, %c0_25] : memref<1x4x128xf32, #tpu.memory_space<vmem>>, vector<1x4x128xf32>
      %31 = vector.shape_cast %30 : vector<1x4x128xf32> to vector<4x128xf32>
      %c0_26 = arith.constant 0 : index
      %c0_27 = arith.constant 0 : index
      %32 = vector.load %arg7[%c0_26, %c0_27] : memref<4x256xf32, #tpu.memory_space<vmem>>, vector<4x128xf32>
      tpu.vector_store %arg7[%c0_26, %c0_27], %31 {strides = array<i32>} : memref<4x256xf32, #tpu.memory_space<vmem>>, vector<4x128xf32>,
    } else {
    }
    %c0 = arith.constant 0 : index
    %c0_3 = arith.constant 0 : index
    %c0_4 = arith.constant 0 : index
    %6 = vector.load %arg3[%c0, %c0_3, %c0_4] : memref<1x4x128xf32, #tpu.memory_space<vmem>>, vector<1x4x128xf32>
    %7 = vector.shape_cast %6 : vector<1x4x128xf32> to vector<4x128xf32>
    %c0_5 = arith.constant 0 : index
    %c128 = arith.constant 128 : index
    %8 = vector.load %arg7[%c0_5, %c128] : memref<4x256xf32, #tpu.memory_space<vmem>>, vector<4x128xf32>
    tpu.vector_store %arg7[%c0_5, %c128], %7 {strides = array<i32>} : memref<4x256xf32, #tpu.memory_space<vmem>>, vector<4x128xf32>,
    %c0_6 = arith.constant 0 : index
    %c0_7 = arith.constant 0 : index
    %9 = vector.load %arg5[%c0_6, %c0_7] : memref<8x1xf32, #tpu.memory_space<vmem>>, vector<8x1xf32>
    %10 = vector.shape_cast %9 : vector<8x1xf32> to vector<8x1xf32>
    %11 = vector.broadcast %10 : vector<8x1xf32> to vector<8x128xf32>
    %c0_8 = arith.constant 0 : index
    %c123 = arith.constant 123 : index
    %12 = vector.load %arg7[%c0_8, %c123] : memref<4x256xf32, #tpu.memory_space<vmem>>, vector<4x128xf32>
    %c0_9 = arith.constant 0 : index
    %c0_10 = arith.constant 0 : index
    %c0_11 = arith.constant 0 : index
    %13 = vector.load %arg4[%c0_9, %c0_10, %c0_11] : memref<3x8x4xf32, #tpu.memory_space<vmem>>, vector<1x8x4xf32>
    %14 = vector.shape_cast %13 : vector<1x8x4xf32> to vector<8x4xf32>
    %cst = arith.constant dense<0.000000e+00> : vector<8x128xf32>
    %15 = tpu.matmul %14, %12, %cst {dimension_numbers = #tpu.dot_dimension_numbers<[1], [0], [0], [1], [0, 0, 1, 1], [], []>} : vector<8x4xf32>, vector<4x128xf32>, vector<8x128xf32> -> vector<8x128xf32>
    %16 = arith.addf %11, %15 : vector<8x128xf32>
    %c0_12 = arith.constant 0 : index
    %c125 = arith.constant 125 : index
    %17 = vector.load %arg7[%c0_12, %c125] : memref<4x256xf32, #tpu.memory_space<vmem>>, vector<4x128xf32>
    %c1 = arith.constant 1 : index
    %c0_13 = arith.constant 0 : index
    %c0_14 = arith.constant 0 : index
    %18 = vector.load %arg4[%c1, %c0_13, %c0_14] : memref<3x8x4xf32, #tpu.memory_space<vmem>>, vector<1x8x4xf32>
    %19 = vector.shape_cast %18 : vector<1x8x4xf32> to vector<8x4xf32>
    %cst_15 = arith.constant dense<0.000000e+00> : vector<8x128xf32>
    %20 = tpu.matmul %19, %17, %cst_15 {dimension_numbers = #tpu.dot_dimension_numbers<[1], [0], [0], [1], [0, 0, 1, 1], [], []>} : vector<8x4xf32>, vector<4x128xf32>, vector<8x128xf32> -> vector<8x128xf32>
    %21 = arith.addf %16, %20 : vector<8x128xf32>
    %c0_16 = arith.constant 0 : index
    %c127 = arith.constant 127 : index
    %22 = vector.load %arg7[%c0_16, %c127] : memref<4x256xf32, #tpu.memory_space<vmem>>, vector<4x128xf32>
    %c2 = arith.constant 2 : index
    %c0_17 = arith.constant 0 : index
    %c0_18 = arith.constant 0 : index
    %23 = vector.load %arg4[%c2, %c0_17, %c0_18] : memref<3x8x4xf32, #tpu.memory_space<vmem>>, vector<1x8x4xf32>
    %24 = vector.shape_cast %23 : vector<1x8x4xf32> to vector<8x4xf32>
    %cst_19 = arith.constant dense<0.000000e+00> : vector<8x128xf32>
    %25 = tpu.matmul %24, %22, %cst_19 {dimension_numbers = #tpu.dot_dimension_numbers<[1], [0], [0], [1], [0, 0, 1, 1], [], []>} : vector<8x4xf32>, vector<4x128xf32>, vector<8x128xf32> -> vector<8x128xf32>
    %26 = arith.addf %21, %25 : vector<8x128xf32>
    %c0_20 = arith.constant 0 : index
    %c0_21 = arith.constant 0 : index
    %c0_22 = arith.constant 0 : index
    %27 = vector.load %arg6[%c0_20, %c0_21, %c0_22] : memref<1x8x128xf32, #tpu.memory_space<vmem>>, vector<1x8x128xf32>
    %28 = vector.shape_cast %27 : vector<1x8x128xf32> to vector<8x128xf32>
    %29 = vector.shape_cast %26 : vector<8x128xf32> to vector<1x8x128xf32>
    tpu.vector_store %arg6[%c0_20, %c0_21, %c0_22], %29 {strides = array<i32>} : memref<1x8x128xf32, #tpu.memory_space<vmem>>, vector<1x8x128xf32>,
    return
  }
  func.func @transform_0(%arg0: i32, %arg1: i32) -> (i32, i32, i32) {
    %c1_i32 = arith.constant 1 : i32
    %0 = arith.muli %arg0, %c1_i32 : i32
    %c1_i32_0 = arith.constant 1 : i32
    %1 = arith.subi %0, %c1_i32_0 : i32
    %c0_i32 = arith.constant 0 : i32
    %2 = arith.maxsi %1, %c0_i32 : i32
    %c0_i32_1 = arith.constant 0 : i32
    %c0_i32_2 = arith.constant 0 : i32
    return %arg1, %c0_i32_1, %2 : i32, i32, i32
  }
  func.func @transform_1(%arg0: i32, %arg1: i32) -> (i32, i32, i32) {
    %c0_i32 = arith.constant 0 : i32
    %c0_i32_0 = arith.constant 0 : i32
    return %arg1, %c0_i32, %arg0 : i32, i32, i32
  }
  func.func @transform_2(%arg0: i32, %arg1: i32) -> (i32, i32, i32) {
    %c0_i32 = arith.constant 0 : i32
    %c0_i32_0 = arith.constant 0 : i32
    %c0_i32_1 = arith.constant 0 : i32
    %c0_i32_2 = arith.constant 0 : i32
    return %c0_i32, %c0_i32_0, %c0_i32_1 : i32, i32, i32
  }
  func.func @transform_3(%arg0: i32, %arg1: i32) -> (i32, i32) {
    %c0_i32 = arith.constant 0 : i32
    %c0_i32_0 = arith.constant 0 : i32
    %c0_i32_1 = arith.constant 0 : i32
    return %c0_i32, %c0_i32_0 : i32, i32
  }
  func.func @transform_4(%arg0: i32, %arg1: i32) -> (i32, i32, i32) {
    %c0_i32 = arith.constant 0 : i32
    %c0_i32_0 = arith.constant 0 : i32
    return %arg1, %c0_i32, %arg0 : i32, i32, i32
  }
}

</mosaic_0001>

<bundles_post_ra>
// kernel: tpu_custom_call.1
= control target key start
LH: loop header
LB: loop body
LE: loop exit
PB: predicated region body
PF: predicated region fallthrough
CT: control target
= control target key end

     0   :  { %9 = vsyncpa [#allocation4], 0  ;;  %s1003_s0 = inlined_call_operand.vmem [shape: f32[2,4,16], index: 0, kind: input, shape index: {}]   ;;  %s1004_s1 = inlined_call_operand.vmem [shape: f32[2,4,16], index: 1, kind: input, shape index: {}]   ;;  %s1005_s2 = inlined_call_operand.vmem [shape: f32[3,8,4], index: 2, kind: input, shape index: {}]   ;;  %s1006_s3 = inlined_call_operand.vmem [shape: f32[8,1], index: 3, kind: input, shape index: {}]   ;;  %s1007_s4 = inlined_call_operand.hbm [shape: f32[2,8,16], index: 4, kind: output, shape index: {}]  }
   0x1   :  { %11 = vsyncpa [#allocation4 + $0x1], 0  ;;  %s870_s15 = smov 0   ;;  %s872_s16 = smov 0  }
   0x2   :  { %s874_s17 = smov 0   ;;  %s876_s0 = smov 0  }
   0x3   :  { %s878_s18 = smov 0   ;;  %s880_s19 = smov 0  }
   0x4 LB: > { %s650_s20 = sadd.s32 4294967295, %s836_s19   ;;  %s651_s21 = sadd.s32 4294967294, %s836_s19   ;;  %s836_s19 = sphi %s880_s19, %s17_s19   ;;  %s832_s18 = sphi %s878_s18, %s1014_s18   ;;  %s828_s0 = sphi %s876_s0, %s1013_s0   ;;  %s824_s17 = sphi %s874_s17, %s1012_s17   ;;  %s820_s16 = sphi %s872_s16, %s1011_s16   ;;  %s816_s15 = sphi %s870_s15, %s1010_s15  }
   0x5   : > { %s26_s22 = sadd.s32 1, %s832_s18  ;;  %s142_s23 = sadd.s32 1, %s824_s17 }
   0x6   : > { %p27_p0 = scmp.ge.s32.totalorder %s26_s22, 2  ;;  %p152_p1 = scmp.ne.s32.totalorder %s824_s17, %s820_s16 }
   0x7   : > { %p153_p2 = scmp.eq.s32.totalorder %s650_s20, 1  ;;  %p158_p3 = scmp.ne.s32.totalorder %s820_s16, %s816_s15 }
   0x8   : > { %s1016_s22 = smov (%p27_p0, %s26_s22), 0  ;;  %p159_p5 = scmp.eq.s32.totalorder %s651_s21, 1 }
   0x9   : > { %p910_p4 = por %p153_p2, %p152_p1  ;;  %s137_s25 = ssub.s32 %s832_s18, %s1016_s22 }
   0xa   : > { %p654_p6 = scmp.ge.s32.totalorder %s836_s19, 1  ;;  %p140_p7 = scmp.eq.s32.totalorder %s137_s25, 0 }
   0xb   : > { %p917_p8 = por %p159_p5, %p158_p3  ;;  %p209_p9 = scmp.lt.s32.totalorder %s836_s19, 3 }
   0xc   : > { %s923_s27 = scalar_select %p140_p7, %s824_s17, %s142_s23  }
   0xd   : > { %p210_p10 = pnand %p654_p6, %p209_p9 }
   0xe   : > { %p260_p11 = scmp.lt.s32.totalorder (!%p210_p10), %s828_s0, 1  ;;  %v838_v0 = vmov (!%p210_p10), 0.0   ;;  %vm839_vm0 = vmmov (!%p210_p10), 0   ;;  %s840_s7 = smov (!%p210_p10), 3   ;;  %v842_v4 = vmov (!%p210_p10), 0   ;;  %v280_v5 = vld [vmem:[%s1006_s3] sm:$0xff] (!%p210_p10) }
   0xf   : > { %213 = sbr.rel (%p210_p10) target bundleno = 392 (0x188), region = 36  ;;  %271 = vst [vmem:[#allocation2] sm:$0xf] (!%p210_p10), %v838_v0  ;;  %676 = vmatprep.subr.mxu1 (!%p210_p10), %v838_v0  ;;  %681 = vmatprep.subr.mxu0 (!%p210_p10), %v838_v0  ;;  %s841_s8 = smov (!%p210_p10), 5   ;;  %vm294_vm1 = vcmask (!%p210_p10), 39936   ;;  %vm383_vm2 = vcmask (!%p210_p10), 23552  }
  0x10   : > { %683 = vmatprep.mubr.msk.f32.mxu0 (!%p210_p10), %vm839_vm0, %v838_v0  ;;  %678 = vmatprep.mubr.msk.f32.mxu1 (!%p210_p10), %vm839_vm0, %v838_v0  ;;  %s843_s9 = smov (!%p210_p10), 1   ;;  %vm300_vm3 = vcmask (!%p210_p10), 1043456   ;;  %vm296_vm4 = vcmask (!%p210_p10), 31744   ;;  %v660_v10 = vld [vmem:[%s1005_s2 + $0x8] sm:$0xff] (!%p210_p10)  ;;  %v287_v13 = vld [vmem:[%s1005_s2] sm:$0xff] (!%p210_p10)  ;;  %vm470_vm5 = vcmask (!%p210_p10), 7168  }
  0x11   : > { %756 = vset.pattern.permute.xlu0 (!%p210_p10), %v842_v4  ;;  %v663_v17 = vld [vmem:[%s1005_s2 + $0x10] sm:$0xff] (!%p210_p10)  ;;  %s244_s25 = sand.u32 (!%p210_p10), 1, %s820_s16  }
  0x16   : > { %s261_s28 = scalar_select %p260_p11, %s828_s0, 1 }
  0x18   : > { %s657_s29 = sshll.u32 %s261_s28, 2  ;;  %s655_s28 = sshll.u32 %s244_s25, 3 }
  0x19   : > { %s266_s6 = scalar_lea.vmem %s1004_s1, %s657_s29  ;;  %s667_s29 = sshll.u32 %s828_s0, 7 }
  0x1a   : > { %v278_v1 = vld [vmem:[%s266_s6] sm:$0xf]  ;;  %s246_s30 = scalar_lea.vmem [#allocation3], %s655_s28  ;;  %s844_s0 = smov [#allocation3]  }
  0x1b   : > { %279 = vst [vmem:[#allocation2 + $0x4] sm:$0xf] %v278_v1  ;;  %s564_s5 = sshll.u32 %s246_s30, 4  ;;  %s762_s11 = sshll.u32 %s844_s0, 4  ;;  %s958_s5 = int_to_ptr.vmem [resolvable:$true] %s564_s5  ;;  %s763_s11 = int_to_ptr.vmem [resolvable:$false] %s762_s11 }
  0x1c   : > { %s758_s10 = scalar_lea.vmem %s958_s5, 128  ;;  %s764_s12 = scalar_lea.vmem %s763_s11, 256 }
  0x1d   : > { %p759_p12 = scmp.ne.s32.totalorder %s958_s5, %s758_s10  ;;  %p765_p1 = scmp.lt.s32.totalorder %s958_s5, %s763_s11 }
  0x1e   : > { %p766_p2 = scmp.lt.s32.totalorder %s764_s12, %s758_s10 }
  0x1f   : > { %p760_p13 = pnand %p759_p12, %p910_p4 }
  0x20   : > { %p767_p3 = por %p766_p2, %p765_p1 }
  0x21   : > { %p761_p0 = pneg %p760_p13 }
  0x22   : > { %v374_v2 = vld [vmem:[#allocation2] sm:$0xff] }
  0x23   : > { %379 = vrot.lane.b32.xlu0 %v374_v2, %s840_s7  ;;  %v378_v3 = vcombine.high %v374_v2, %v374_v2  ;;  %290 = vrot.lane.b32.xlu1 %v374_v2, %s841_s8  ;;  %p768_p5 = pnand %p767_p3, %p761_p0 }
  0x27   : > { %381 = vrot.lane.b32.xlu0 %v378_v3, %s840_s7  ;;  %292 = vrot.lane.b32.xlu1 %v378_v3, %s841_s8  ;;  %s956_s8 = scalar_lea.hbm %s1007_s4, %s667_s29 }
  0x2b   : > { %466 = vrot.lane.b32.xlu0 %v374_v2, %s843_s9  ;;  %468 = vrot.lane.b32.xlu1 %v378_v3, %s843_s9  ;;  %s550_s9 = scalar_lea.sflag [#allocation4], %s244_s25 }
  0x2f   : > { %283 = vperm.xlu0 %756, %v280_v5  }
  0x95   : > { %v380_v6 = vpop.permute.xlu0 %379  ;;  %v291_v7 = vpop.permute.xlu1 %290 }
  0x99   : > { %v382_v8 = vpop.permute.xlu0 %381  ;;  %v293_v9 = vpop.permute.xlu1 %292 }
  0x9a   : > { %v295_v11 = vsel %vm294_vm1, %v291_v7, %v293_v9  ;;  %v384_v12 = vsel %vm383_vm2, %v380_v6, %v382_v8 }
  0x9b   : > { %677 = vmatpush3.msk.msra.mxu1 %vm300_vm3, %v295_v11  ;;  %682 = vmatpush3.msk.msra.mxu0 %vm300_vm3, %v384_v12 }
  0x9c   : > { %684 = vmatmul.mubr.msk.f32.vlgmr.msra.gmra.mrb[0].mxu0 %vm296_vm4, %v660_v10  ;;  %686 = vmatprep.subr.mxu0 %v838_v0 }
  0x9d   : > { %v467_v14 = vpop.permute.xlu0 %466  ;;  %v469_v15 = vpop.permute.xlu1 %468  ;;  %679 = vmatmul.mubr.msk.f32.vlgmr.msra.gmra.mrb[0].mxu1 %vm296_vm4, %v287_v13  ;;  %688 = vmatprep.mubr.msk.f32.mxu0 %vm839_vm0, %v838_v0 }
  0x9e   : > { %v471_v16 = vsel %vm470_vm5, %v467_v14, %v469_v15 }
  0x9f   : > { %687 = vmatpush3.msk.msra.mxu0 %vm300_vm3, %v471_v16 }
  0xa4   : > { %689 = vmatmul.mubr.msk.f32.vlgmr.msra.gmra.mrb[0].mxu0 %vm296_vm4, %v663_v17 }
  0xae   : > { %v284_v19 = vpop.permute.xlu0 %283 }
 0x170   : > { %v369_v18 = vpop.f32.mrb[0].mxu1 }
 0x171   : > { %v680_v20 = vpop.f32.mrb[1].mxu1  ;;  %v373_v21 = vadd.f32 %v369_v18, %v284_v19 }
 0x177   : > { %v543_v22 = vpop.f32.mrb[0].mxu0 }
 0x178   : > { %v692_v23 = vadd.f32 %v543_v22, %v373_v21  ;;  %v690_v24 = vpop.f32.mrb[1].mxu0 }
 0x17a   : > { %548 = vst [vmem:[%s246_s30] sm:$0xff] %v692_v23 }
 0x17b   : > { %771 = shalt.err (!%p768_p5)
}
 0x17c   : > { %s772_s13 = scalar_lea.hbm %s956_s8, 128  ;;  %s776_s21 = scalar_lea.hbm %s1007_s4, 256 }
 0x17d   : > { %p773_p6 = scmp.ne.s32.totalorder %s956_s8, %s772_s13  ;;  %p777_p10 = scmp.lt.u32.totalorder %s956_s8, %s1007_s4 }
 0x17e   : > { %p778_p11 = scmp.lt.u32.totalorder %s776_s21, %s772_s13  ;;  %p780_p13 = scmp.lt.u32.totalorder %s772_s13, %s956_s8 }
 0x17f   : > { %p774_p7 = pnand %p773_p6, %p910_p4 }
 0x180   : > { %p779_p12 = por %p778_p11, %p777_p10 }
 0x181   : > { %p775_p9 = pneg %p774_p7 }
 0x182   : > { %p781_p0 = por %p780_p13, %p779_p12 }
 0x184   : > { %p782_p1 = pnand %p781_p0, %p775_p9 }
 0x186   : > { %785 = shalt.err (!%p782_p1)
}
 0x187   : > { %695 = dma.vmem_to_hbm [thread:$0]  (%p910_p4), %s958_s5, 128, %s956_s8, %s550_s9  }
 0x188 PF: > { %p701_p2 = scmp.ge.s32.totalorder %s836_s19, 2  ;;  %s576_s28 = sand.u32 1, %s816_s15  }
 0x189   : > { %s577_s29 = scalar_lea.sflag [#allocation4], %s576_s28 }
 0x18a   : > { %p698_p3 = pnand %p701_p2, %p917_p8 }
 0x18c   : > { %811 = dma.done.wait (!%p698_p3), %s577_s29, 128  }
 0x18d   : > { %813 = vsyncadd (!%p698_p3), %s577_s29, 4294967168  ;;  %s17_s19 = sadd.s32 1, %s836_s19   ;;  %s1010_s15 = smov %s820_s16 }
 0x18e   : > { %p14_p5 = scmp.ge.s32.totalorder %s17_s19, 4   ;;  %s1011_s16 = smov %s824_s17 }
 0x18f   : > { %s1012_s17 = smov %s923_s27  ;;  %s1013_s0 = smov %s832_s18 }
 0x190   : > { %s1014_s18 = smov %s1016_s22  ;;  %16 = sbr.rel (!%p14_p5) target bundleno = 4 (0x4), region = 84 }
 0x197   :  { %582 = vsyncpa [#allocation4], 1 }
 0x198   :  { %584 = vsyncpa [#allocation4 + $0x1], 1 }

</bundles_post_ra>
